<compile_context>
chip_gen: v6e
topology: v6e:2x2x1
jax: 0.10.0
libtpu: 0.0.40
codegen_flags: <defaults>
</compile_context>

<pallas_src>
import jax
import jax.numpy as jnp
from jax.experimental import pallas as pl
from jax.experimental.pallas import tpu as pltpu


def attention_layer_kernel(e1_ref, e2_ref, w_ref, ut_ref, out_ref, alpha_ref):
    e1 = e1_ref[...]                      # (tn, in_feat)
    e2 = e2_ref[...]                      # (tn, in_feat)
    w = w_ref[...]                        # (in_feat, out_feat)
    u_row = ut_ref[...]                   # (1, out_feat)  -- u_omega transposed

    # v = tanh(emb @ w_omega) per modality (MXU matmul, f32 accumulation).
    v1 = jnp.tanh(jnp.dot(e1, w, preferred_element_type=jnp.float32))
    v2 = jnp.tanh(jnp.dot(e2, w, preferred_element_type=jnp.float32))

    # vu = v @ u_omega  as a VPU multiply + lane reduction (avoids a width-1
    # MXU matmul per modality).  Shapes: (tn, 1).
    vu1 = jnp.sum(v1 * u_row, axis=-1, keepdims=True) + 1e-6
    vu2 = jnp.sum(v2 * u_row, axis=-1, keepdims=True) + 1e-6

    # Numerically-stable softmax over the 2 modalities.
    m = jnp.maximum(vu1, vu2)
    x1 = jnp.exp(vu1 - m)
    x2 = jnp.exp(vu2 - m)
    inv_denom = 1.0 / (x1 + x2)           # exact divide (stays within 1e-5 tol)
    a1 = x1 * inv_denom                   # (tn, 1)
    a2 = x2 * inv_denom                   # (tn, 1)

    # emb_combined = alpha-weighted sum of modality embeddings (lane-dense store).
    out_ref[...] = a1 * e1 + a2 * e2      # (tn, in_feat)

    # alpha: write the two columns directly (no concat relayout).
    alpha_ref[:, 0:1] = a1
    alpha_ref[:, 1:2] = a2


def _choose_tile_n(N, in_feat, out_feat, vmem_budget_bytes):
    """Pick the largest power-of-two row tile that fits the VMEM budget."""
    # Per-row VMEM bytes: double-buffered inputs (e1, e2) and outputs
    # (emb_combined, alpha) plus v1/v2-sized intermediates.
    bytes_per_row = 4 * (2 * (2 * in_feat)   # e1, e2 (x2 buffers)
                         + 2 * in_feat       # emb_combined (x2 buffers)
                         + 2 * 2             # alpha (x2 buffers)
                         + 4 * out_feat)     # v1, v2 + headroom
    fixed = 4 * 2 * (in_feat * out_feat + out_feat)   # weights (x2 buffers)

    tile_n = 1024
    while tile_n > 8 and tile_n * bytes_per_row + fixed > vmem_budget_bytes:
        tile_n //= 2
    # Keep >=2 grid steps when possible so both v7x TensorCores get work.
    while tile_n > 8 and pl.cdiv(N, tile_n) < 2:
        tile_n //= 2
    return max(8, tile_n)


def attention_layer(emb1, emb2, w_omega, u_omega, *, tile_n=None,
                    vmem_budget_bytes=20 * 1024 * 1024):
    emb1 = jnp.asarray(emb1, jnp.float32)
    emb2 = jnp.asarray(emb2, jnp.float32)
    w_omega = jnp.asarray(w_omega, jnp.float32)
    u_omega = jnp.asarray(u_omega, jnp.float32)

    N, in_feat = emb1.shape
    in_feat_w, out_feat = w_omega.shape
    assert in_feat_w == in_feat and emb2.shape == (N, in_feat)
    assert u_omega.shape == (out_feat, 1)

    if tile_n is None:
        tile_n = _choose_tile_n(N, in_feat, out_feat, vmem_budget_bytes)

    # Pad N up to a tile multiple (zero rows, sliced off afterwards).
    n_blocks = pl.cdiv(N, tile_n)
    N_pad = n_blocks * tile_n
    if N_pad != N:
        pad = N_pad - N
        emb1_p = jnp.pad(emb1, ((0, pad), (0, 0)))
        emb2_p = jnp.pad(emb2, ((0, pad), (0, 0)))
    else:
        emb1_p, emb2_p = emb1, emb2

    u_t = u_omega.T                       # (1, out_feat): lane-friendly layout

    out_shapes = (
        jax.ShapeDtypeStruct((N_pad, in_feat), jnp.float32),  # emb_combined
        jax.ShapeDtypeStruct((N_pad, 2), jnp.float32),        # alpha
    )
    out, alpha = pl.pallas_call(
        attention_layer_kernel,
        out_shape=out_shapes,
        grid_spec=pltpu.PrefetchScalarGridSpec(
            num_scalar_prefetch=0,
            grid=(n_blocks,),
            in_specs=[
                pl.BlockSpec((tile_n, in_feat), lambda i: (i, 0)),    # emb1 tile
                pl.BlockSpec((tile_n, in_feat), lambda i: (i, 0)),    # emb2 tile
                pl.BlockSpec((in_feat, out_feat), lambda i: (0, 0)),  # w_omega (full)
                pl.BlockSpec((1, out_feat), lambda i: (0, 0)),        # u_omega^T (full)
            ],
            out_specs=[
                pl.BlockSpec((tile_n, in_feat), lambda i: (i, 0)),
                pl.BlockSpec((tile_n, 2), lambda i: (i, 0)),
            ],
        ),
        compiler_params=pltpu.CompilerParams(
            dimension_semantics=("parallel",),
            vmem_limit_bytes=32 * 1024 * 1024,
        ),
    )(emb1_p, emb2_p, w_omega, u_t)

    if N_pad != N:
        out = out[:N]
        alpha = alpha[:N]
    return out, alpha


def _reference(emb1, emb2, w_omega, u_omega):
    emb = jnp.stack([emb1, emb2], axis=1)                       # (N, 2, D)
    v = jnp.tanh(jnp.einsum("nmd,df->nmf", emb, w_omega))
    vu = jnp.einsum("nmf,fo->nmo", v, u_omega)[..., 0]          # (N, 2)
    alpha = jax.nn.softmax(vu + 1e-6, axis=1)
    out = jnp.einsum("nmd,nm->nd", emb, alpha)
    return out, alpha


if __name__ == "__main__":
    # Small deterministic setup consistent with the module:
    #   in_feat = 128, out_feat = 64, batch N = 16
    N, in_feat, out_feat = 16, 128, 64
    key = jax.random.PRNGKey(0)
    k1, k2, kw, ku = jax.random.split(key, 4)

    emb1 = jax.random.normal(k1, (N, in_feat), dtype=jnp.float32)
    emb2 = jax.random.normal(k2, (N, in_feat), dtype=jnp.float32)

    # Xavier-uniform init (same bound formula as torch).
    bound_w = (6.0 / (in_feat + out_feat)) ** 0.5
    bound_u = (6.0 / (out_feat + 1)) ** 0.5
    w_omega = jax.random.uniform(kw, (in_feat, out_feat), jnp.float32,
                                 minval=-bound_w, maxval=bound_w)
    u_omega = jax.random.uniform(ku, (out_feat, 1), jnp.float32,
                                 minval=-bound_u, maxval=bound_u)

    emb_combined, alpha = attention_layer(emb1, emb2, w_omega, u_omega)
    jax.block_until_ready((emb_combined, alpha))

    ref_out, ref_alpha = _reference(emb1, emb2, w_omega, u_omega)
    assert jnp.allclose(emb_combined, ref_out, atol=1e-5, rtol=1e-5)
    assert jnp.allclose(alpha, ref_alpha, atol=1e-5, rtol=1e-5)

    print("KERNEL_OK")
</pallas_src>

<mosaic_0001>
module attributes {stable_mosaic.version = 11 : i64} {
  func.func @attention_layer_kernel(%arg0: i32, %arg1: memref<8x128xf32, #tpu.memory_space<vmem>>, %arg2: memref<8x128xf32, #tpu.memory_space<vmem>>, %arg3: memref<128x64xf32, #tpu.memory_space<vmem>>, %arg4: memref<1x64xf32, #tpu.memory_space<vmem>>, %arg5: memref<8x128xf32, #tpu.memory_space<vmem>>, %arg6: memref<8x2xf32, #tpu.memory_space<vmem>>) attributes {dimension_semantics = [#tpu.dimension_semantics<parallel>], iteration_bounds = array<i64: 2>, scalar_prefetch = 0 : i64, scratch_operands = 0 : i64, tpu.core_type = #tpu.core_type<tc>, window_params = [{transform_indices = @transform_0, window_bounds = array<i64: 8, 128>}, {transform_indices = @transform_1, window_bounds = array<i64: 8, 128>}, {pipeline_mode = #tpu.pipeline_mode<synchronous>, transform_indices = @transform_2, window_bounds = array<i64: 128, 64>}, {pipeline_mode = #tpu.pipeline_mode<synchronous>, transform_indices = @transform_3, window_bounds = array<i64: 1, 64>}, {transform_indices = @transform_4, window_bounds = array<i64: 8, 128>}, {transform_indices = @transform_5, window_bounds = array<i64: 8, 2>}]} {
    %c0 = arith.constant 0 : index
    %c0_0 = arith.constant 0 : index
    %0 = vector.load %arg1[%c0, %c0_0] : memref<8x128xf32, #tpu.memory_space<vmem>>, vector<8x128xf32>
    %c0_1 = arith.constant 0 : index
    %c0_2 = arith.constant 0 : index
    %1 = vector.load %arg2[%c0_1, %c0_2] : memref<8x128xf32, #tpu.memory_space<vmem>>, vector<8x128xf32>
    %c0_3 = arith.constant 0 : index
    %c0_4 = arith.constant 0 : index
    %2 = vector.load %arg3[%c0_3, %c0_4] : memref<128x64xf32, #tpu.memory_space<vmem>>, vector<128x64xf32>
    %c0_5 = arith.constant 0 : index
    %c0_6 = arith.constant 0 : index
    %3 = vector.load %arg4[%c0_5, %c0_6] : memref<1x64xf32, #tpu.memory_space<vmem>>, vector<1x64xf32>
    %cst = arith.constant dense<0.000000e+00> : vector<8x64xf32>
    %4 = tpu.matmul %0, %2, %cst {dimension_numbers = #tpu.dot_dimension_numbers<[1], [0], [0], [1], [0, 0, 1, 1], [], []>} : vector<8x128xf32>, vector<128x64xf32>, vector<8x64xf32> -> vector<8x64xf32>
    %5 = math.tanh %4 : vector<8x64xf32>
    %cst_7 = arith.constant dense<0.000000e+00> : vector<8x64xf32>
    %6 = tpu.matmul %1, %2, %cst_7 {dimension_numbers = #tpu.dot_dimension_numbers<[1], [0], [0], [1], [0, 0, 1, 1], [], []>} : vector<8x128xf32>, vector<128x64xf32>, vector<8x64xf32> -> vector<8x64xf32>
    %7 = math.tanh %6 : vector<8x64xf32>
    %8 = vector.broadcast %3 : vector<1x64xf32> to vector<8x64xf32>
    %9 = arith.mulf %5, %8 : vector<8x64xf32>
    %cst_8 = arith.constant dense<0.000000e+00> : vector<8xf32>
    %10 = vector.multi_reduction <add>, %9, %cst_8 [1] : vector<8x64xf32> to vector<8xf32>
    %11 = vector.shape_cast %10 : vector<8xf32> to vector<8x1xf32>
    %cst_9 = arith.constant 9.99999997E-7 : f32
    %12 = vector.broadcast %cst_9 : f32 to vector<8x1xf32>
    %13 = arith.addf %11, %12 : vector<8x1xf32>
    %14 = vector.broadcast %3 : vector<1x64xf32> to vector<8x64xf32>
    %15 = arith.mulf %7, %14 : vector<8x64xf32>
    %cst_10 = arith.constant dense<0.000000e+00> : vector<8xf32>
    %16 = vector.multi_reduction <add>, %15, %cst_10 [1] : vector<8x64xf32> to vector<8xf32>
    %17 = vector.shape_cast %16 : vector<8xf32> to vector<8x1xf32>
    %cst_11 = arith.constant 9.99999997E-7 : f32
    %18 = vector.broadcast %cst_11 : f32 to vector<8x1xf32>
    %19 = arith.addf %17, %18 : vector<8x1xf32>
    %20 = arith.maximumf %13, %19 : vector<8x1xf32>
    %21 = arith.subf %13, %20 : vector<8x1xf32>
    %22 = math.exp %21 : vector<8x1xf32>
    %23 = arith.subf %19, %20 : vector<8x1xf32>
    %24 = math.exp %23 : vector<8x1xf32>
    %25 = arith.addf %22, %24 : vector<8x1xf32>
    %cst_12 = arith.constant 1.000000e+00 : f32
    %26 = vector.broadcast %cst_12 : f32 to vector<8x1xf32>
    %27 = arith.divf %26, %25 : vector<8x1xf32>
    %28 = arith.mulf %22, %27 : vector<8x1xf32>
    %29 = arith.mulf %24, %27 : vector<8x1xf32>
    %30 = vector.broadcast %28 : vector<8x1xf32> to vector<8x128xf32>
    %31 = arith.mulf %30, %0 : vector<8x128xf32>
    %32 = vector.broadcast %29 : vector<8x1xf32> to vector<8x128xf32>
    %33 = arith.mulf %32, %1 : vector<8x128xf32>
    %34 = arith.addf %31, %33 : vector<8x128xf32>
    %c0_13 = arith.constant 0 : index
    %c0_14 = arith.constant 0 : index
    %35 = vector.load %arg5[%c0_13, %c0_14] : memref<8x128xf32, #tpu.memory_space<vmem>>, vector<8x128xf32>
    tpu.vector_store %arg5[%c0_13, %c0_14], %34 {strides = array<i32>} : memref<8x128xf32, #tpu.memory_space<vmem>>, vector<8x128xf32>,
    %c0_15 = arith.constant 0 : index
    %c0_16 = arith.constant 0 : index
    %36 = vector.load %arg6[%c0_15, %c0_16] : memref<8x2xf32, #tpu.memory_space<vmem>>, vector<8x1xf32>
    tpu.vector_store %arg6[%c0_15, %c0_16], %28 {strides = array<i32>} : memref<8x2xf32, #tpu.memory_space<vmem>>, vector<8x1xf32>,
    %c0_17 = arith.constant 0 : index
    %c1 = arith.constant 1 : index
    %37 = vector.load %arg6[%c0_17, %c1] : memref<8x2xf32, #tpu.memory_space<vmem>>, vector<8x1xf32>
    tpu.vector_store %arg6[%c0_17, %c1], %29 {strides = array<i32>} : memref<8x2xf32, #tpu.memory_space<vmem>>, vector<8x1xf32>,
    return
  }
  func.func @transform_0(%arg0: i32) -> (i32, i32) {
    %c0_i32 = arith.constant 0 : i32
    %c0_i32_0 = arith.constant 0 : i32
    return %arg0, %c0_i32 : i32, i32
  }
  func.func @transform_1(%arg0: i32) -> (i32, i32) {
    %c0_i32 = arith.constant 0 : i32
    %c0_i32_0 = arith.constant 0 : i32
    return %arg0, %c0_i32 : i32, i32
  }
  func.func @transform_2(%arg0: i32) -> (i32, i32) {
    %c0_i32 = arith.constant 0 : i32
    %c0_i32_0 = arith.constant 0 : i32
    %c0_i32_1 = arith.constant 0 : i32
    return %c0_i32, %c0_i32_0 : i32, i32
  }
  func.func @transform_3(%arg0: i32) -> (i32, i32) {
    %c0_i32 = arith.constant 0 : i32
    %c0_i32_0 = arith.constant 0 : i32
    %c0_i32_1 = arith.constant 0 : i32
    return %c0_i32, %c0_i32_0 : i32, i32
  }
  func.func @transform_4(%arg0: i32) -> (i32, i32) {
    %c0_i32 = arith.constant 0 : i32
    %c0_i32_0 = arith.constant 0 : i32
    return %arg0, %c0_i32 : i32, i32
  }
  func.func @transform_5(%arg0: i32) -> (i32, i32) {
    %c0_i32 = arith.constant 0 : i32
    %c0_i32_0 = arith.constant 0 : i32
    return %arg0, %c0_i32 : i32, i32
  }
}

</mosaic_0001>

<bundles_post_ra>
// kernel: tpu_custom_call.1
= control target key start
LH: loop header
LB: loop body
LE: loop exit
PB: predicated region body
PF: predicated region fallthrough
CT: control target
= control target key end

     0   :  { %11 = vsyncpa [#allocation3], 0  ;;  %s1008_s0 = inlined_call_operand.vmem [shape: f32[16,128], index: 0, kind: input, shape index: {}]   ;;  %s1009_s1 = inlined_call_operand.vmem [shape: f32[16,128], index: 1, kind: input, shape index: {}]   ;;  %s1010_s2 = inlined_call_operand.vmem [shape: f32[128,64], index: 2, kind: input, shape index: {}]   ;;  %s1011_s3 = inlined_call_operand.vmem [shape: f32[1,64], index: 3, kind: input, shape index: {}]   ;;  %s1012_s4 = inlined_call_operand.hbm [shape: f32[16,128], index: 4, kind: output, shape index: {0}]   ;;  %s1013_s5 = inlined_call_operand.vmem [shape: f32[16,2], index: 5, kind: output, shape index: {1}]  }
   0x1   :  { %13 = vsyncpa [#allocation3 + $0x1], 0  ;;  %s825_s18 = smov 0   ;;  %s827_s19 = smov 0  }
   0x2   :  { %s829_s20 = smov 0   ;;  %s831_s21 = smov 0  }
   0x3 LB: > { %s846_s22 = sadd.s32 4294967295, %s790_s21   ;;  %s562_s23 = sadd.s32 4294967294, %s790_s21   ;;  %s790_s21 = sphi %s831_s21, %s1019_s21   ;;  %s786_s20 = sphi %s829_s20, %s1018_s20   ;;  %s782_s19 = sphi %s827_s19, %s1017_s19   ;;  %s778_s18 = sphi %s825_s18, %s1016_s18  }
   0x4   : > { %s850_s24 = sadd.s32 1, %s790_s21   ;;  %s120_s25 = sadd.s32 1, %s786_s20 }
   0x5   : > { %s117_s26 = ssub.s32 %s790_s21, %s850_s24  ;;  %p130_p0 = scmp.ne.s32.totalorder %s786_s20, %s782_s19 }
   0x6   : > { %p118_p1 = scmp.eq.s32.totalorder %s117_s26, 0  ;;  %p131_p2 = scmp.eq.s32.totalorder %s846_s22, 1 }
   0x7   : > { %p136_p3 = scmp.ne.s32.totalorder %s782_s19, %s778_s18  ;;  %p137_p4 = scmp.eq.s32.totalorder %s562_s23, 1 }
   0x8   : > { %s861_s27 = scalar_select %p118_p1, %s786_s20, %s120_s25  }
   0x9   : > { %p863_p5 = por %p131_p2, %p130_p0  ;;  %p867_p6 = por %p137_p4, %p136_p3 }
   0xa   : > { %p565_p7 = scmp.ge.s32.totalorder %s790_s21, 1  ;;  %p201_p8 = scmp.lt.s32.totalorder %s790_s21, 3 }
   0xc   : > { %p202_p9 = pnand %p565_p7, %p201_p8 }
   0xd   : > { %p236_p10 = scmp.lt.s32.totalorder (!%p202_p9), %s846_s22, 1  ;;  %s227_s15 = sand.u32 (!%p202_p9), 1, %s782_s19  }
   0xe   : > { %205 = sbr.rel (%p202_p9) target bundleno = 462 (0x1ce), region = 36  ;;  %s566_s17 = sshll.u32 (!%p202_p9), %s227_s15, 3 }
   0xf   : > { %s572_s30 = sshll.u32 (!%p202_p9), %s846_s22, 7  ;;  %s229_s6 = scalar_lea.vmem (!%p202_p9), [#allocation2], %s566_s17 }
  0x10   : > { %s462_s10 = scalar_lea.hbm (!%p202_p9), %s1012_s4, %s572_s30 }
  0x13   : > { %v265_v0 = vld [vmem:[%s1010_s2 + $0x78] sm:$0xff]  ;;  %v792_v1 = vmov 0.0   ;;  %v264_v2 = vld [vmem:[%s1010_s2 + $0x70] sm:$0xff]  ;;  %v263_v3 = vld [vmem:[%s1010_s2 + $0x68] sm:$0xff]  ;;  %s237_s11 = scalar_select %p236_p10, %s846_s22, 1  ;;  %vm793_vm0 = vmmov 0  }
  0x14   : > { %609 = vmatprep.subr.mxu0 %v792_v1  ;;  %644 = vmatprep.subr.mxu1 %v792_v1  ;;  %v262_v4 = vld [vmem:[%s1010_s2 + $0x60] sm:$0xff]  ;;  %v261_v5 = vld [vmem:[%s1010_s2 + $0x58] sm:$0xff]  ;;  %v260_v6 = vld [vmem:[%s1010_s2 + $0x50] sm:$0xff]  ;;  %vm416_vm1 = vcmask 523264   ;;  %vm442_vm2 = vcmask 7168   ;;  %vm444_vm3 = vcmask 15368  }
  0x15   : > { %610 = vmatpush3.msra.mxu0 %v265_v0  ;;  %645 = vmatpush3.msra.mxu1 %v265_v0  ;;  %v259_v7 = vld [vmem:[%s1010_s2 + $0x48] sm:$0xff]  ;;  %v258_v8 = vld [vmem:[%s1010_s2 + $0x40] sm:$0xff]  ;;  %v257_v9 = vld [vmem:[%s1010_s2 + $0x38] sm:$0xff]  ;;  %s938_s16 = sshll.u32 %s237_s11, 3  ;;  %s794_s22 = smov [#allocation2]  }
  0x16   : > { %611 = vmatprep.subr.mxu0 %v792_v1  ;;  %646 = vmatprep.subr.mxu1 %v792_v1  ;;  %v256_v10 = vld [vmem:[%s1010_s2 + $0x30] sm:$0xff]  ;;  %v255_v11 = vld [vmem:[%s1010_s2 + $0x28] sm:$0xff]  ;;  %v254_v12 = vld [vmem:[%s1010_s2 + $0x20] sm:$0xff]  ;;  %s239_s7 = scalar_lea.vmem %s1008_s0, %s938_s16  ;;  %s243_s12 = scalar_lea.vmem %s1009_s1, %s938_s16 }
  0x17   : > { %612 = vmatpush3.msra.mxu0 %v264_v2  ;;  %647 = vmatpush3.msra.mxu1 %v264_v2  ;;  %v253_v13 = vld [vmem:[%s1010_s2 + $0x18] sm:$0xff]  ;;  %v252_v14 = vld [vmem:[%s1010_s2 + $0x10] sm:$0xff]  ;;  %v251_v15 = vld [vmem:[%s1010_s2 + $0x8] sm:$0xff]  ;;  %s247_s26 = scalar_lea.vmem %s1013_s5, %s938_s16  ;;  %s447_s16 = scalar_lea.sflag [#allocation3], %s227_s15 }
  0x18   : > { %613 = vmatprep.subr.mxu0 %v792_v1  ;;  %648 = vmatprep.subr.mxu1 %v792_v1  ;;  %v250_v16 = vld [vmem:[%s1010_s2] sm:$0xff] }
  0x19   : > { %614 = vmatpush3.msra.mxu0 %v263_v3  ;;  %649 = vmatpush3.msra.mxu1 %v263_v3  ;;  %v248_v17 = vld [vmem:[%s239_s7] sm:$0xff]  ;;  %s464_s7 = sshll.u32 %s229_s6, 4  ;;  %s465_s7 = int_to_ptr.vmem [resolvable:$true] %s464_s7 }
  0x1a   : > { %615 = vmatprep.subr.mxu0 %v792_v1  ;;  %650 = vmatprep.subr.mxu1 %v792_v1  ;;  %v249_v18 = vld [vmem:[%s243_s12] sm:$0xff]  ;;  %s730_s11 = scalar_lea.vmem %s465_s7, 128  ;;  %s734_s12 = sshll.u32 %s794_s22, 4  ;;  %s735_s12 = int_to_ptr.vmem [resolvable:$false] %s734_s12 }
  0x1b   : > { %616 = vmatpush3.msra.mxu0 %v262_v4  ;;  %651 = vmatpush3.msra.mxu1 %v262_v4  ;;  %v570_v23 = vld [vmem:[%s1011_s3] ss:$0 sm:$0xff]  ;;  %p731_p11 = scmp.ne.s32.totalorder %s465_s7, %s730_s11  ;;  %s736_s13 = scalar_lea.vmem %s735_s12, 256 }
  0x1c   : > { %617 = vmatprep.subr.mxu0 %v792_v1  ;;  %652 = vmatprep.subr.mxu1 %v792_v1  ;;  %p737_p0 = scmp.lt.s32.totalorder %s465_s7, %s735_s12  ;;  %p738_p1 = scmp.lt.s32.totalorder %s736_s13, %s730_s11 }
  0x1d   : > { %618 = vmatpush3.msra.mxu0 %v261_v5  ;;  %653 = vmatpush3.msra.mxu1 %v261_v5  ;;  %p732_p12 = pnand %p731_p11, %p863_p5 }
  0x1e   : > { %619 = vmatprep.subr.mxu0 %v792_v1  ;;  %654 = vmatprep.subr.mxu1 %v792_v1  ;;  %p739_p2 = por %p738_p1, %p737_p0 }
  0x1f   : > { %620 = vmatpush3.msra.mxu0 %v260_v6  ;;  %655 = vmatpush3.msra.mxu1 %v260_v6  ;;  %p733_p13 = pneg %p732_p12 }
  0x20   : > { %621 = vmatprep.subr.mxu0 %v792_v1  ;;  %656 = vmatprep.subr.mxu1 %v792_v1 }
  0x21   : > { %622 = vmatpush3.msra.mxu0 %v259_v7  ;;  %657 = vmatpush3.msra.mxu1 %v259_v7  ;;  %p740_p3 = pnand %p739_p2, %p733_p13 }
  0x22   : > { %623 = vmatprep.subr.mxu0 %v792_v1  ;;  %658 = vmatprep.subr.mxu1 %v792_v1 }
  0x23   : > { %624 = vmatpush3.msra.mxu0 %v258_v8  ;;  %659 = vmatpush3.msra.mxu1 %v258_v8 }
  0x24   : > { %625 = vmatprep.subr.mxu0 %v792_v1  ;;  %660 = vmatprep.subr.mxu1 %v792_v1 }
  0x25   : > { %626 = vmatpush3.msra.mxu0 %v257_v9  ;;  %661 = vmatpush3.msra.mxu1 %v257_v9 }
  0x26   : > { %627 = vmatprep.subr.mxu0 %v792_v1  ;;  %662 = vmatprep.subr.mxu1 %v792_v1 }
  0x27   : > { %628 = vmatpush3.msra.mxu0 %v256_v10  ;;  %663 = vmatpush3.msra.mxu1 %v256_v10 }
  0x28   : > { %629 = vmatprep.subr.mxu0 %v792_v1  ;;  %664 = vmatprep.subr.mxu1 %v792_v1 }
  0x29   : > { %630 = vmatpush3.msra.mxu0 %v255_v11  ;;  %665 = vmatpush3.msra.mxu1 %v255_v11 }
  0x2a   : > { %631 = vmatprep.subr.mxu0 %v792_v1  ;;  %666 = vmatprep.subr.mxu1 %v792_v1 }
  0x2b   : > { %632 = vmatpush3.msra.mxu0 %v254_v12  ;;  %667 = vmatpush3.msra.mxu1 %v254_v12 }
  0x2c   : > { %633 = vmatprep.subr.mxu0 %v792_v1  ;;  %668 = vmatprep.subr.mxu1 %v792_v1 }
  0x2d   : > { %634 = vmatpush3.msra.mxu0 %v253_v13  ;;  %669 = vmatpush3.msra.mxu1 %v253_v13 }
  0x2e   : > { %635 = vmatprep.subr.mxu0 %v792_v1  ;;  %670 = vmatprep.subr.mxu1 %v792_v1 }
  0x2f   : > { %636 = vmatpush3.msra.mxu0 %v252_v14  ;;  %671 = vmatpush3.msra.mxu1 %v252_v14 }
  0x30   : > { %637 = vmatprep.subr.mxu0 %v792_v1  ;;  %672 = vmatprep.subr.mxu1 %v792_v1 }
  0x31   : > { %638 = vmatpush3.msra.mxu0 %v251_v15  ;;  %641 = vmatprep.mubr.msk.f32.mxu0 %vm793_vm0, %v792_v1 }
  0x32   : > { %639 = vmatprep.subr.mxu0 %v792_v1  ;;  %673 = vmatpush3.msra.mxu1 %v251_v15 }
  0x33   : > { %640 = vmatpush3.msra.mxu0 %v250_v16  ;;  %674 = vmatprep.subr.mxu1 %v792_v1 }
  0x34   : > { %642 = vmatmul.mubr.f32.vlgmr.msra.gmra.mxu0 %v248_v17  ;;  %675 = vmatpush3.msra.mxu1 %v250_v16 }
  0x35   : > { %676 = vmatprep.mubr.msk.f32.mxu1 %vm793_vm0, %v792_v1 }
  0x36   : > { %677 = vmatmul.mubr.f32.vlgmr.msra.gmra.mxu1 %v249_v18 }
  0xf4   : > { %v333_v19 = vpop.f32.mrf.mxu0 }
  0xf5   : > { %720 = vtanh.f32 %v333_v19 }
  0xf6   : > { %v643_v20 = vpop.f32.mrf.mxu0  ;;  %v404_v21 = vpop.f32.mrf.mxu1 }
  0xf7   : > { %722 = vtanh.f32 %v404_v21 }
  0xf8   : > { %v678_v22 = vpop.f32.mrf.mxu1 }
 0x102   : > { %v721_v24 = vpop.eup %720 }
 0x103   : > { %v415_v25 = vmul.f32 %v721_v24, %v570_v23 }
 0x104   : > { %v723_v26 = vpop.eup %722 }
 0x105   : > { %v417_v27 = vsel %vm416_vm1, %v415_v25, 0.0  ;;  %v421_v28 = vmul.f32 %v723_v26, %v570_v23 }
 0x106   : > { %418 = vadd.xlane.f32.xlu0 %v417_v27 }
 0x107   : > { %v422_v29 = vsel %vm416_vm1, %v421_v28, 0.0 }
 0x10a   : > { %423 = vadd.xlane.f32.xlu0 %v422_v29 }
 0x18f   : > { %v419_v30 = vpop.xlane.xlu0 %418 }
 0x190   : > { %v420_v32 = vadd.f32 1e-06, %v419_v30 }
 0x193   : > { %v424_v31 = vpop.xlane.xlu0 %423 }
 0x194   : > { %v425_v33 = vadd.f32 1e-06, %v424_v31 }
 0x196   : > { %v426_v34 = vmax.f32 %v420_v32, %v425_v33 }
 0x198   : > { %v427_v35 = vsub.f32 %v420_v32, %v426_v34  ;;  %v430_v36 = vsub.f32 %v425_v33, %v426_v34 }
 0x19a   : > { %v428_v37 = vmul.f32 1.442695, %v427_v35  ;;  %v431_v38 = vmul.f32 1.442695, %v430_v36 }
 0x19c   : > { %724 = vpow2.f32 %v428_v37 }
 0x19d   : > { %726 = vpow2.f32 %v431_v38 }
 0x1a9   : > { %v725_v39 = vpop.eup %724 }
 0x1aa   : > { %v727_v40 = vpop.eup %726 }
 0x1ab   : > { %v433_v41 = vadd.f32 %v727_v40, %v725_v39 }
 0x1ad   : > { %728 = vrcp.f32 %v433_v41 }
 0x1ba   : > { %v729_v42 = vpop.eup %728 }
 0x1bb   : > { %v436_v43 = vmul.f32 %v729_v42, %v725_v39  ;;  %v437_v44 = vmul.f32 %v729_v42, %v727_v40 }
 0x1bd   : > { %v438_v45 = vmul.f32 %v436_v43, %v248_v17  ;;  %v439_v46 = vmul.f32 %v437_v44, %v249_v18  ;;  %443 = vst.msk [vmem:[%s247_s26] sm:$0xff] %vm442_vm2, %v436_v43 }
 0x1be   : > { %445 = vst.msk [vmem:[%s247_s26] sm:$0xff] %vm444_vm3, %v437_v44 }
 0x1bf   : > { %v440_v47 = vadd.f32 %v439_v46, %v438_v45 }
 0x1c1   : > { %441 = vst [vmem:[%s229_s6] sm:$0xff] %v440_v47 }
 0x1c2   : > { %743 = shalt.err (!%p740_p3)
}
 0x1c3   : > { %s744_s14 = scalar_lea.hbm %s462_s10, 128  ;;  %s748_s23 = scalar_lea.hbm %s1012_s4, 256 }
 0x1c4   : > { %p745_p4 = scmp.ne.s32.totalorder %s462_s10, %s744_s14  ;;  %p749_p9 = scmp.lt.s32.totalorder %s462_s10, %s1012_s4 }
 0x1c5   : > { %p750_p10 = scmp.lt.s32.totalorder %s748_s23, %s744_s14 }
 0x1c6   : > { %p746_p7 = pnand %p745_p4, %p863_p5 }
 0x1c7   : > { %p751_p11 = por %p750_p10, %p749_p9 }
 0x1c8   : > { %p747_p8 = pneg %p746_p7 }
 0x1ca   : > { %p752_p12 = pnand %p751_p11, %p747_p8 }
 0x1cc   : > { %755 = shalt.err (!%p752_p12)
}
 0x1cd   : > { %679 = dma.vmem_to_hbm [thread:$0]  (%p863_p5), %s465_s7, 128, %s462_s10, %s447_s16  }
 0x1ce PF: > { %p685_p13 = scmp.ge.s32.totalorder %s790_s21, 2  ;;  %s479_s30 = sand.u32 1, %s778_s18  }
 0x1cf   : > { %s480_s6 = scalar_lea.sflag [#allocation3], %s479_s30 }
 0x1d0   : > { %p682_p0 = pnand %p685_p13, %p867_p6 }
 0x1d2   : > { %p683_p1 = pneg %p682_p0 }
 0x1d4   : > { %773 = dma.done.wait (%p683_p1), %s480_s6, 128  }
 0x1d5   : > { %775 = vsyncadd (%p683_p1), %s480_s6, 4294967168  ;;  %p16_p2 = scmp.ge.s32.totalorder %s850_s24, 4   ;;  %s1016_s18 = smov %s782_s19 }
 0x1d6   : > { %s1017_s19 = smov %s786_s20  ;;  %s1018_s20 = smov %s861_s27 }
 0x1d7   : > { %s1019_s21 = smov %s850_s24  ;;  %18 = sbr.rel (!%p16_p2) target bundleno = 3 (0x3), region = 86 }
 0x1dc   :  { %492 = vsyncpa [#allocation3], 1 }
 0x1dd   :  { %494 = vsyncpa [#allocation3 + $0x1], 1 }

</bundles_post_ra>
